<compile_context>
chip_gen: v6e
topology: v6e:2x2x1
jax: 0.10.0
libtpu: 0.0.40
codegen_flags: <defaults>
</compile_context>

<pallas_src>
import functools

import jax
import jax.numpy as jnp
import numpy as np
from jax import lax
from jax.experimental import pallas as pl
from jax.experimental.pallas import tpu as pltpu


def _round_up(x, m):
    return (x + m - 1) // m * m


def _dual_sim_pooler_kernel(x_ref, w_ref, b_ref, mask_ref, pooled_ref, y_ref, *, A, O):
    # x_ref    : [TB, 2H]   = [x1 | x2] per batch row
    # w_ref    : [2H, A+O]  = blockdiag(W_attr, W_obj)   (VMEM-resident)
    # b_ref    : [1, A+O]   = [b_attr | b_obj]           (VMEM-resident)
    # mask_ref : [1, A*O]   = feasible_mask (pre-divided by temp when scale)
    x = x_ref[...]

    # Single fused MXU push for both Linear layers (fp32 accumulation).
    y = jnp.dot(x, w_ref[...], preferred_element_type=jnp.float32) + b_ref[...]
    y_ref[...] = y.astype(y_ref.dtype)          # one wide store: [attr | obj]

    pa = y[:, :A]            # [TB, A]  dense_attr(x1)
    po = y[:, A:]            # [TB, O]  dense_obj(x2)

    # F.normalize(dim=-1): x / max(||x||_2, eps), eps=1e-12  ==  x * rsqrt(max(ssq, eps^2)).
    # rsqrt keeps the per-row work on the EUP slot; everything wide is a multiply.
    eps2 = jnp.float32(1e-24)
    inv_a = lax.rsqrt(jnp.maximum(jnp.sum(pa * pa, axis=-1, keepdims=True), eps2))
    inv_o = lax.rsqrt(jnp.maximum(jnp.sum(po * po, axis=-1, keepdims=True), eps2))
    na = pa * inv_a          # [TB, A]
    no = po * inv_o          # [TB, O]

    # Flattened outer product built as ONE [TB, A*O] value and stored with a
    # single full-width (lane-dense) store.  Lanes [a*O, (a+1)*O) hold
    # na[:, a] * no, i.e. exactly torch.flatten(sim, start_dim=1) ordering.
    sim = jnp.concatenate([na[:, a:a + 1] * no for a in range(A)], axis=1)  # [TB, A*O]
    pooled_ref[...] = (sim * mask_ref[...]).astype(pooled_ref.dtype)


def dual_similarity_pooler(hidden_states, w_attr, b_attr, w_obj, b_obj,
                           unseen_score, *, temp=0.05, scale=False,
                           max_batch_tile=1024, vmem_limit_bytes=None):
    """hidden_states: [B, S, H] f32; w_attr: [H, A]; w_obj: [H, O];
    unseen_score (feasible_mask): [A*O].
    Returns (pooled [B, A*O], attr [B, A], obj [B, O])."""
    B, S, H = hidden_states.shape
    A = w_attr.shape[1]
    O = w_obj.shape[1]
    AO = A * O

    # [x1 | x2] per row.  With allow_input_fusion on operand 0, XLA may fuse this
    # slice+reshape directly into the pallas_call operand (no extra HBM copy).
    x_cat = hidden_states[:, :2, :].reshape(B, 2 * H)

    # Fused block-diagonal weight / concatenated bias (VMEM-resident across grid steps).
    w_cat = (jnp.zeros((2 * H, A + O), jnp.float32)
             .at[:H, :A].set(w_attr.astype(jnp.float32))
             .at[H:, A:].set(w_obj.astype(jnp.float32)))
    b_cat = jnp.concatenate([b_attr, b_obj]).astype(jnp.float32).reshape(1, A + O)

    # Fold the temperature into the mask so the kernel never divides a wide tile.
    mask = unseen_score.astype(jnp.float32).reshape(1, AO)
    if scale:
        mask = mask / jnp.float32(temp)

    # ---- generation-aware VMEM budgeting ----
    if vmem_limit_bytes is None:
        try:
            info = pltpu.get_tpu_info()
            vmem_cap = int(getattr(info, "vmem_capacity_bytes", 64 * 1024 * 1024))
        except Exception:
            vmem_cap = 64 * 1024 * 1024          # conservative: v7x per-TC VMEM
        vmem_limit_bytes = max(32 * 1024 * 1024,
                               min(vmem_cap * 3 // 4, 96 * 1024 * 1024))

    # Resident (constant-index-map) operands are still double-buffered by default.
    resident_bytes = 2 * 4 * (2 * H * (A + O) + (A + O) + AO)
    per_row_bytes = 4 * (2 * H + AO + (A + O))   # x row + pooled row + y row
    tile_budget = max(vmem_limit_bytes // 2 - resident_bytes, 16 * per_row_bytes)
    tb = tile_budget // (2 * per_row_bytes)      # x2: double-buffered tiled operands
    tb = min(tb, max_batch_tile)
    if B <= 8:
        tb = B                                    # block == full batch dim
    else:
        # Ensure >=2 grid blocks so both TensorCores get work on v7x;
        # one extra ~0.35us grid step is negligible on single-TC chips.
        tb = min(tb, _round_up(pl.cdiv(B, 2), 8))
        tb = max(8, (tb // 8) * 8)

    grid = (pl.cdiv(B, tb),)                      # ragged last block handled by Pallas
    kernel = functools.partial(_dual_sim_pooler_kernel, A=A, O=O)

    pooled, y_out = pl.pallas_call(
        kernel,
        out_shape=(
            jax.ShapeDtypeStruct((B, AO), jnp.float32),
            jax.ShapeDtypeStruct((B, A + O), jnp.float32),
        ),
        grid=grid,
        in_specs=[
            pl.BlockSpec((tb, 2 * H), lambda i: (i, 0)),      # x_cat  (tiled over batch)
            pl.BlockSpec((2 * H, A + O), lambda i: (0, 0)),   # W_cat  (resident)
            pl.BlockSpec((1, A + O), lambda i: (0, 0)),       # b_cat  (resident)
            pl.BlockSpec((1, AO), lambda i: (0, 0)),          # mask   (resident)
        ],
        out_specs=(
            pl.BlockSpec((tb, AO), lambda i: (i, 0)),         # pooled (lane-dense, flat)
            pl.BlockSpec((tb, A + O), lambda i: (i, 0)),      # [attr | obj]
        ),
        compiler_params=pltpu.CompilerParams(
            dimension_semantics=("parallel",),
            vmem_limit_bytes=int(vmem_limit_bytes),
            allow_input_fusion=[True, False, False, False],
        ),
    )(x_cat, w_cat, b_cat, mask)

    # Split the merged linear output outside the kernel (tiny arrays).
    attr_out = y_out[:, :A]
    obj_out = y_out[:, A:]
    return pooled, attr_out, obj_out


def _reference(hidden_states, w_attr, b_attr, w_obj, b_obj, feasible_mask,
               temp=0.05, scale=False):
    x1 = hidden_states[:, 0, :]
    x2 = hidden_states[:, 1, :]
    pa = x1 @ w_attr + b_attr
    po = x2 @ w_obj + b_obj
    eps = 1e-12
    na = pa / np.maximum(np.linalg.norm(pa, axis=-1, keepdims=True), eps)
    no = po / np.maximum(np.linalg.norm(po, axis=-1, keepdims=True), eps)
    sim = na[:, :, None] * no[:, None, :]
    if scale:
        sim = sim / temp
    pooled = sim.reshape(sim.shape[0], -1) * feasible_mask[None, :]
    return pooled, pa, po


if __name__ == "__main__":
    H, ATTR, OBJ, S = 32, 8, 8, 8
    TEMP = 0.05

    key = jax.random.PRNGKey(0)
    k_hs, k_wa, k_ba, k_wo, k_bo, k_mask, k_hs2 = jax.random.split(key, 7)

    bound = 1.0 / float(np.sqrt(H))
    w_attr = jax.random.uniform(k_wa, (H, ATTR), jnp.float32, -bound, bound)
    b_attr = jax.random.uniform(k_ba, (ATTR,), jnp.float32, -bound, bound)
    w_obj = jax.random.uniform(k_wo, (H, OBJ), jnp.float32, -bound, bound)
    b_obj = jax.random.uniform(k_bo, (OBJ,), jnp.float32, -bound, bound)
    feasible_mask = jax.random.uniform(k_mask, (ATTR * OBJ,), jnp.float32, 0.0, 1.0)

    # --- case 1: small batch, single grid step, scale=False ---
    B1 = 2
    hs1 = jax.random.normal(k_hs, (B1, S, H), dtype=jnp.float32)
    pooled1, attr1, obj1 = dual_similarity_pooler(
        hs1, w_attr, b_attr, w_obj, b_obj, feasible_mask, temp=TEMP, scale=False)
    jax.block_until_ready((pooled1, attr1, obj1))

    ref_p1, ref_a1, ref_o1 = _reference(
        np.asarray(hs1), np.asarray(w_attr), np.asarray(b_attr),
        np.asarray(w_obj), np.asarray(b_obj), np.asarray(feasible_mask),
        temp=TEMP, scale=False)
    np.testing.assert_allclose(np.asarray(pooled1), ref_p1, rtol=2e-5, atol=2e-5)
    np.testing.assert_allclose(np.asarray(attr1), ref_a1, rtol=2e-5, atol=2e-5)
    np.testing.assert_allclose(np.asarray(obj1), ref_o1, rtol=2e-5, atol=2e-5)

    # --- case 2: larger batch exercising multiple grid blocks + ragged last block, scale=True ---
    B2 = 20
    hs2 = jax.random.normal(k_hs2, (B2, S, H), dtype=jnp.float32)
    pooled2, attr2, obj2 = dual_similarity_pooler(
        hs2, w_attr, b_attr, w_obj, b_obj, feasible_mask,
        temp=TEMP, scale=True, max_batch_tile=8)
    jax.block_until_ready((pooled2, attr2, obj2))

    ref_p2, ref_a2, ref_o2 = _reference(
        np.asarray(hs2), np.asarray(w_attr), np.asarray(b_attr),
        np.asarray(w_obj), np.asarray(b_obj), np.asarray(feasible_mask),
        temp=TEMP, scale=True)
    np.testing.assert_allclose(np.asarray(pooled2), ref_p2, rtol=1e-4, atol=1e-4)
    np.testing.assert_allclose(np.asarray(attr2), ref_a2, rtol=2e-5, atol=2e-5)
    np.testing.assert_allclose(np.asarray(obj2), ref_o2, rtol=2e-5, atol=2e-5)

    print("KERNEL_OK")
</pallas_src>

<mosaic_0001>
module attributes {stable_mosaic.version = 11 : i64} {
  func.func @_dual_sim_pooler_kernel(%arg0: i32, %arg1: memref<2x64xf32, #tpu.memory_space<vmem>>, %arg2: memref<64x16xf32, #tpu.memory_space<vmem>>, %arg3: memref<1x16xf32, #tpu.memory_space<vmem>>, %arg4: memref<1x64xf32, #tpu.memory_space<vmem>>, %arg5: memref<2x64xf32, #tpu.memory_space<vmem>>, %arg6: memref<2x16xf32, #tpu.memory_space<vmem>>) attributes {dimension_semantics = [#tpu.dimension_semantics<parallel>], iteration_bounds = array<i64: 1>, scalar_prefetch = 0 : i64, scratch_operands = 0 : i64, tpu.core_type = #tpu.core_type<tc>, window_params = [{transform_indices = @transform_0, window_bounds = array<i64: 2, 64>}, {pipeline_mode = #tpu.pipeline_mode<synchronous>, transform_indices = @transform_1, window_bounds = array<i64: 64, 16>}, {pipeline_mode = #tpu.pipeline_mode<synchronous>, transform_indices = @transform_2, window_bounds = array<i64: 1, 16>}, {pipeline_mode = #tpu.pipeline_mode<synchronous>, transform_indices = @transform_3, window_bounds = array<i64: 1, 64>}, {transform_indices = @transform_4, window_bounds = array<i64: 2, 64>}, {transform_indices = @transform_5, window_bounds = array<i64: 2, 16>}]} {
    %c0 = arith.constant 0 : index
    %c0_0 = arith.constant 0 : index
    %0 = vector.load %arg1[%c0, %c0_0] : memref<2x64xf32, #tpu.memory_space<vmem>>, vector<2x64xf32>
    %c0_1 = arith.constant 0 : index
    %c0_2 = arith.constant 0 : index
    %1 = vector.load %arg2[%c0_1, %c0_2] : memref<64x16xf32, #tpu.memory_space<vmem>>, vector<64x16xf32>
    %cst = arith.constant dense<0.000000e+00> : vector<2x16xf32>
    %2 = tpu.matmul %0, %1, %cst {dimension_numbers = #tpu.dot_dimension_numbers<[1], [0], [0], [1], [0, 0, 1, 1], [], []>} : vector<2x64xf32>, vector<64x16xf32>, vector<2x16xf32> -> vector<2x16xf32>
    %c0_3 = arith.constant 0 : index
    %c0_4 = arith.constant 0 : index
    %3 = vector.load %arg3[%c0_3, %c0_4] : memref<1x16xf32, #tpu.memory_space<vmem>>, vector<1x16xf32>
    %4 = vector.broadcast %3 : vector<1x16xf32> to vector<2x16xf32>
    %5 = arith.addf %2, %4 : vector<2x16xf32>
    %c0_5 = arith.constant 0 : index
    %c0_6 = arith.constant 0 : index
    %6 = vector.load %arg6[%c0_5, %c0_6] : memref<2x16xf32, #tpu.memory_space<vmem>>, vector<2x16xf32>
    tpu.vector_store %arg6[%c0_5, %c0_6], %5 {strides = array<i32>} : memref<2x16xf32, #tpu.memory_space<vmem>>, vector<2x16xf32>,
    %7 = vector.extract_strided_slice %5 {offsets = [0, 0], sizes = [2, 8], strides = [1, 1]} : vector<2x16xf32> to vector<2x8xf32>
    %8 = vector.extract_strided_slice %5 {offsets = [0, 8], sizes = [2, 8], strides = [1, 1]} : vector<2x16xf32> to vector<2x8xf32>
    %9 = arith.mulf %7, %7 : vector<2x8xf32>
    %cst_7 = arith.constant dense<0.000000e+00> : vector<2xf32>
    %10 = vector.multi_reduction <add>, %9, %cst_7 [1] : vector<2x8xf32> to vector<2xf32>
    %11 = vector.shape_cast %10 : vector<2xf32> to vector<2x1xf32>
    %cst_8 = arith.constant 1.000000e-24 : f32
    %12 = vector.broadcast %cst_8 : f32 to vector<2x1xf32>
    %13 = arith.maximumf %11, %12 : vector<2x1xf32>
    %14 = math.rsqrt %13 : vector<2x1xf32>
    %15 = arith.mulf %8, %8 : vector<2x8xf32>
    %cst_9 = arith.constant dense<0.000000e+00> : vector<2xf32>
    %16 = vector.multi_reduction <add>, %15, %cst_9 [1] : vector<2x8xf32> to vector<2xf32>
    %17 = vector.shape_cast %16 : vector<2xf32> to vector<2x1xf32>
    %cst_10 = arith.constant 1.000000e-24 : f32
    %18 = vector.broadcast %cst_10 : f32 to vector<2x1xf32>
    %19 = arith.maximumf %17, %18 : vector<2x1xf32>
    %20 = math.rsqrt %19 : vector<2x1xf32>
    %21 = vector.broadcast %14 : vector<2x1xf32> to vector<2x8xf32>
    %22 = arith.mulf %7, %21 : vector<2x8xf32>
    %23 = vector.broadcast %20 : vector<2x1xf32> to vector<2x8xf32>
    %24 = arith.mulf %8, %23 : vector<2x8xf32>
    %25 = vector.extract_strided_slice %22 {offsets = [0, 0], sizes = [2, 1], strides = [1, 1]} : vector<2x8xf32> to vector<2x1xf32>
    %26 = vector.broadcast %25 : vector<2x1xf32> to vector<2x8xf32>
    %27 = arith.mulf %26, %24 : vector<2x8xf32>
    %28 = vector.extract_strided_slice %22 {offsets = [0, 1], sizes = [2, 1], strides = [1, 1]} : vector<2x8xf32> to vector<2x1xf32>
    %29 = vector.broadcast %28 : vector<2x1xf32> to vector<2x8xf32>
    %30 = arith.mulf %29, %24 : vector<2x8xf32>
    %31 = vector.extract_strided_slice %22 {offsets = [0, 2], sizes = [2, 1], strides = [1, 1]} : vector<2x8xf32> to vector<2x1xf32>
    %32 = vector.broadcast %31 : vector<2x1xf32> to vector<2x8xf32>
    %33 = arith.mulf %32, %24 : vector<2x8xf32>
    %34 = vector.extract_strided_slice %22 {offsets = [0, 3], sizes = [2, 1], strides = [1, 1]} : vector<2x8xf32> to vector<2x1xf32>
    %35 = vector.broadcast %34 : vector<2x1xf32> to vector<2x8xf32>
    %36 = arith.mulf %35, %24 : vector<2x8xf32>
    %37 = vector.extract_strided_slice %22 {offsets = [0, 4], sizes = [2, 1], strides = [1, 1]} : vector<2x8xf32> to vector<2x1xf32>
    %38 = vector.broadcast %37 : vector<2x1xf32> to vector<2x8xf32>
    %39 = arith.mulf %38, %24 : vector<2x8xf32>
    %40 = vector.extract_strided_slice %22 {offsets = [0, 5], sizes = [2, 1], strides = [1, 1]} : vector<2x8xf32> to vector<2x1xf32>
    %41 = vector.broadcast %40 : vector<2x1xf32> to vector<2x8xf32>
    %42 = arith.mulf %41, %24 : vector<2x8xf32>
    %43 = vector.extract_strided_slice %22 {offsets = [0, 6], sizes = [2, 1], strides = [1, 1]} : vector<2x8xf32> to vector<2x1xf32>
    %44 = vector.broadcast %43 : vector<2x1xf32> to vector<2x8xf32>
    %45 = arith.mulf %44, %24 : vector<2x8xf32>
    %46 = vector.extract_strided_slice %22 {offsets = [0, 7], sizes = [2, 1], strides = [1, 1]} : vector<2x8xf32> to vector<2x1xf32>
    %47 = vector.broadcast %46 : vector<2x1xf32> to vector<2x8xf32>
    %48 = arith.mulf %47, %24 : vector<2x8xf32>
    %49 = tpu.concatenate %27, %30, %33, %36, %39, %42, %45, %48 in 1 : vector<2x8xf32>, vector<2x8xf32>, vector<2x8xf32>, vector<2x8xf32>, vector<2x8xf32>, vector<2x8xf32>, vector<2x8xf32>, vector<2x8xf32> -> vector<2x64xf32>
    %c0_11 = arith.constant 0 : index
    %c0_12 = arith.constant 0 : index
    %50 = vector.load %arg4[%c0_11, %c0_12] : memref<1x64xf32, #tpu.memory_space<vmem>>, vector<1x64xf32>
    %51 = vector.broadcast %50 : vector<1x64xf32> to vector<2x64xf32>
    %52 = arith.mulf %49, %51 : vector<2x64xf32>
    %c0_13 = arith.constant 0 : index
    %c0_14 = arith.constant 0 : index
    %53 = vector.load %arg5[%c0_13, %c0_14] : memref<2x64xf32, #tpu.memory_space<vmem>>, vector<2x64xf32>
    tpu.vector_store %arg5[%c0_13, %c0_14], %52 {strides = array<i32>} : memref<2x64xf32, #tpu.memory_space<vmem>>, vector<2x64xf32>,
    return
  }
  func.func @transform_0(%arg0: i32) -> (i32, i32) {
    %c0_i32 = arith.constant 0 : i32
    %c0_i32_0 = arith.constant 0 : i32
    return %arg0, %c0_i32 : i32, i32
  }
  func.func @transform_1(%arg0: i32) -> (i32, i32) {
    %c0_i32 = arith.constant 0 : i32
    %c0_i32_0 = arith.constant 0 : i32
    %c0_i32_1 = arith.constant 0 : i32
    return %c0_i32, %c0_i32_0 : i32, i32
  }
  func.func @transform_2(%arg0: i32) -> (i32, i32) {
    %c0_i32 = arith.constant 0 : i32
    %c0_i32_0 = arith.constant 0 : i32
    %c0_i32_1 = arith.constant 0 : i32
    return %c0_i32, %c0_i32_0 : i32, i32
  }
  func.func @transform_3(%arg0: i32) -> (i32, i32) {
    %c0_i32 = arith.constant 0 : i32
    %c0_i32_0 = arith.constant 0 : i32
    %c0_i32_1 = arith.constant 0 : i32
    return %c0_i32, %c0_i32_0 : i32, i32
  }
  func.func @transform_4(%arg0: i32) -> (i32, i32) {
    %c0_i32 = arith.constant 0 : i32
    %c0_i32_0 = arith.constant 0 : i32
    return %arg0, %c0_i32 : i32, i32
  }
  func.func @transform_5(%arg0: i32) -> (i32, i32) {
    %c0_i32 = arith.constant 0 : i32
    %c0_i32_0 = arith.constant 0 : i32
    return %arg0, %c0_i32 : i32, i32
  }
}

</mosaic_0001>

<bundles_post_ra>
// kernel: tpu_custom_call.1
= control target key start
LH: loop header
LB: loop body
LE: loop exit
PB: predicated region body
PF: predicated region fallthrough
CT: control target
= control target key end

     0   :  { %11 = vsyncpa [#allocation3], 0  ;;  %v358_v1 = vmov 0.0   ;;  %vm359_vm0 = vmmov 0   ;;  %s448_s0 = inlined_call_operand.vmem [shape: f32[2,64], index: 0, kind: input, shape index: {}]   ;;  %s449_s1 = inlined_call_operand.vmem [shape: f32[64,16], index: 1, kind: input, shape index: {}]   ;;  %s450_s2 = inlined_call_operand.vmem [shape: f32[1,16], index: 2, kind: input, shape index: {}]   ;;  %s451_s3 = inlined_call_operand.vmem [shape: f32[1,64], index: 3, kind: input, shape index: {}]   ;;  %s452_s4 = inlined_call_operand.hbm [shape: f32[2,64], index: 4, kind: output, shape index: {0}]   ;;  %s453_s5 = inlined_call_operand.hbm [shape: f32[2,16], index: 5, kind: output, shape index: {1}]  }
   0x1   :  { %v29_v0 = vld [vmem:[%s449_s1 + $0x38] sm:$0xff]  ;;  %264 = vmatprep.subr.mxu0 %v358_v1  ;;  %v28_v2 = vld [vmem:[%s449_s1 + $0x30] sm:$0xff]  ;;  %280 = vmatprep.mubr.msk.f32.mxu0 %vm359_vm0, %v358_v1  ;;  %v27_v3 = vld [vmem:[%s449_s1 + $0x28] sm:$0xff] }
   0x2   :  { %265 = vmatpush3.msra.mxu0 %v29_v0 }
   0x3   :  { %266 = vmatprep.subr.mxu0 %v358_v1 }
   0x4   :  { %12 = vsyncpa [#allocation5], 0  ;;  %267 = vmatpush3.msra.mxu0 %v28_v2  ;;  %v26_v4 = vld [vmem:[%s449_s1 + $0x20] sm:$0xff]  ;;  %v25_v5 = vld [vmem:[%s449_s1 + $0x18] sm:$0xff]  ;;  %vm37_vm1 = vcmask 523264   ;;  %vm111_vm2 = vcmask 123904  }
   0x5   :  { %268 = vmatprep.subr.mxu0 %v358_v1  ;;  %v24_v6 = vld [vmem:[%s449_s1 + $0x10] sm:$0xff]  ;;  %v23_v7 = vld [vmem:[%s449_s1 + $0x8] sm:$0xff]  ;;  %v22_v8 = vld [vmem:[%s449_s1] sm:$0xff]  ;;  %vm114_vm3 = vcmask 58368   ;;  %s360_s1 = smov 120   ;;  %v361_v16 = vmov 4  }
   0x6   :  { %269 = vmatpush3.msra.mxu0 %v27_v3  ;;  %v21_v9 = vld [vmem:[%s448_s0] sm:$0x3]  ;;  %305 = vset.pattern.permute.xlu0 %v361_v16  ;;  %v362_v17 = vmov 0   ;;  %v363_v24 = vmov 7   ;;  %v364_v25 = vmov 2   ;;  %v365_v26 = vmov 3  }
   0x7   :  { %270 = vmatprep.subr.mxu0 %v358_v1  ;;  %v252_v10 = vld [vmem:[%s450_s2] ss:$0 sm:$0xff]  ;;  %302 = vset.pattern.permute.xlu1 %v362_v17  ;;  %v366_v27 = vmov 5   ;;  %v367_v28 = vmov 6   ;;  %v368_v29 = vmov 1   ;;  %s369_s0 = smov 8  }
   0x8   :  { %271 = vmatpush3.msra.mxu0 %v26_v4  ;;  %s370_s2 = smov [#allocation4]   ;;  %s371_s14 = smov 16  }
   0x9   :  { %272 = vmatprep.subr.mxu0 %v358_v1  ;;  %s240_s13 = sshll.u32 %s370_s2, 4  ;;  %s372_s15 = smov 24   ;;  %s241_s13 = int_to_ptr.vmem [resolvable:$true] %s240_s13 }
   0xa   :  { %273 = vmatpush3.msra.mxu0 %v25_v5  ;;  %s314_s16 = scalar_lea.vmem %s241_s13, 32  ;;  %p319_p1 = scmp.lt.s32.totalorder %s241_s13, %s241_s13 }
   0xb   :  { %274 = vmatprep.subr.mxu0 %v358_v1  ;;  %p315_p0 = scmp.ne.s32.totalorder %s241_s13, %s314_s16  ;;  %p320_p2 = scmp.lt.s32.totalorder %s314_s16, %s314_s16 }
   0xc   :  { %275 = vmatpush3.msra.mxu0 %v24_v6 }
   0xd   :  { %276 = vmatprep.subr.mxu0 %v358_v1  ;;  %p321_p3 = por %p320_p2, %p319_p1 }
   0xe   :  { %277 = vmatpush3.msra.mxu0 %v23_v7 }
   0xf   :  { %278 = vmatprep.subr.mxu0 %v358_v1  ;;  %p322_p4 = pnand %p321_p3, %p315_p0 }
  0x10   :  { %279 = vmatpush3.msra.mxu0 %v22_v8 }
  0x11   :  { %281 = vmatmul.mubr.msk.f32.vlgmr.msra.gmra.mxu0 %vm37_vm1, %v21_v9 }
  0xd1   :  { %v107_v11 = vpop.f32.mrf.mxu0 }
  0xd2   :  { %v108_v12 = vadd.f32 %v252_v10, %v107_v11 }
  0xd3   :  { %v282_v13 = vpop.f32.mrf.mxu0 }
  0xd4   :  { %v113_v14 = vmul.f32 %v108_v12, %v108_v12  ;;  %112 = vst.msk [vmem:[#allocation4] sm:$0x3] %vm111_vm2, %v108_v12 }
  0xd6   :  { %v115_v15 = vsel %vm114_vm3, %v113_v14, 0.0 }
  0xd7   :  { %116 = vadd.xlane.f32.xlu0 %v115_v15 }
  0xed   :  { %121 = vrot.lane.b32.xlu0 %v113_v14, %s360_s1 }
 0x160   :  { %v117_v18 = vpop.xlane.xlu0 %116 }
 0x161   :  { %v118_v19 = vmax.f32 %v117_v18, 1e-24 }
 0x163   :  { %310 = vrsqrt.f32 %v118_v19 }
 0x164   :  { %v122_v20 = vpop.permute.xlu0 %121 }
 0x165   :  { %v124_v21 = vsel %vm114_vm3, %v122_v20, 0.0 }
 0x166   :  { %125 = vadd.xlane.f32.xlu1 %v124_v21 }
 0x170   :  { %v311_v22 = vpop.eup %310 }
 0x171   :  { %v129_v23 = vmul.f32 %v311_v22, %v108_v12 }
 0x173   :  { %153 = vperm.xlu0 %305, %v129_v23  }
 0x177   :  { %308 = vset.pattern.permute.xlu0 %v363_v24  ;;  %133 = vperm.xlu1 %302, %v129_v23  }
 0x178   :  { %168 = vperm.xlu0 %308, %v129_v23  }
 0x17b   :  { %303 = vset.pattern.permute.xlu1 %v364_v25 }
 0x17c   :  { %143 = vperm.xlu1 %303, %v129_v23  }
 0x180   :  { %304 = vset.pattern.permute.xlu1 %v365_v26 }
 0x181   :  { %148 = vperm.xlu1 %304, %v129_v23  }
 0x185   :  { %306 = vset.pattern.permute.xlu1 %v366_v27 }
 0x186   :  { %158 = vperm.xlu1 %306, %v129_v23  }
 0x18a   :  { %307 = vset.pattern.permute.xlu1 %v367_v28 }
 0x18b   :  { %163 = vperm.xlu1 %307, %v129_v23  }
 0x18f   :  { %309 = vset.pattern.permute.xlu1 %v368_v29 }
 0x190   :  { %138 = vperm.xlu1 %309, %v129_v23  }
 0x1ee   :  { %v154_v40 = vpop.permute.xlu0 %153 }
 0x1ef   :  { %v126_v30 = vpop.xlane.xlu1 %125 }
 0x1f0   :  { %v127_v31 = vmax.f32 %v126_v30, 1e-24 }
 0x1f2   :  { %312 = vrsqrt.f32 %v127_v31 }
 0x1f3   :  { %v134_v32 = vpop.permute.xlu1 %133 }
 0x1f7   :  { %v144_v33 = vpop.permute.xlu1 %143 }
 0x1fc   :  { %v149_v34 = vpop.permute.xlu1 %148 }
 0x1ff   :  { %v313_v35 = vpop.eup %312 }
 0x200   :  { %v130_v36 = vmul.f32 %v313_v35, %v108_v12 }
 0x201   :  { %v159_v37 = vpop.permute.xlu1 %158 }
 0x202   :  { %v136_v38 = vmul.f32 %v134_v32, %v130_v36  ;;  %v146_v39 = vmul.f32 %v144_v33, %v130_v36  ;;  %v151_v41 = vmul.f32 %v149_v34, %v130_v36  ;;  %v156_v42 = vmul.f32 %v154_v40, %v130_v36 }
 0x204   :  { %173 = vrot.lane.b32.xlu1 %v136_v38, %s360_s1  ;;  %177 = vrot.lane.b32.xlu0 %v146_v39, %s369_s0 }
 0x206   :  { %v164_v43 = vpop.permute.xlu1 %163 }
 0x208   :  { %181 = vrot.lane.b32.xlu1 %v151_v41, %s371_s14  ;;  %185 = vrot.lane.b32.xlu0 %v156_v42, %s372_s15 }
 0x209   :  { %325 = shalt.err (!%p322_p4)
}
 0x20a   :  { %243 = dma.vmem_to_hbm [thread:$0]  %s241_s13, 32, %s453_s5, [#allocation5]   ;;  %v161_v44 = vmul.f32 %v159_v37, %v130_v36  ;;  %v166_v45 = vmul.f32 %v164_v43, %v130_v36  ;;  %v169_v46 = vpop.permute.xlu0 %168  ;;  %vm200_vm4 = vcmask 64512   ;;  %vm202_vm5 = vcmask 130048   ;;  %v254_v61 = vld [vmem:[%s451_s3] ss:$0 sm:$0xff] }
 0x20b   :  { %s373_s19 = smov 32   ;;  %s374_s20 = smov 40   ;;  %v171_v47 = vmul.f32 %v169_v46, %v130_v36  ;;  %v139_v48 = vpop.permute.xlu1 %138  ;;  %vm204_vm6 = vcmask 195584   ;;  %vm206_vm7 = vcmask 261120   ;;  %vm208_vm8 = vcmask 326656  }
 0x20c   :  { %189 = vrot.lane.b32.xlu1 %v161_v44, %s373_s19  ;;  %193 = vrot.lane.b32.xlu0 %v166_v45, %s374_s20  ;;  %s375_s21 = smov 48   ;;  %v141_v49 = vmul.f32 %v139_v48, %v130_v36  ;;  %vm210_vm9 = vcmask 392192   ;;  %vm212_vm10 = vcmask 457728   ;;  %s376_s23 = smov [#allocation2]   ;;  %vm222_vm11 = vcmask 517120  }
 0x20d   :  { %s230_s24 = sshll.u32 %s376_s23, 4  ;;  %s231_s24 = int_to_ptr.vmem [resolvable:$true] %s230_s24 }
 0x20e   :  { %s334_s25 = scalar_lea.vmem %s231_s24, 32  ;;  %p339_p6 = scmp.lt.s32.totalorder %s231_s24, %s231_s24 }
 0x20f   :  { %p335_p5 = scmp.ne.s32.totalorder %s231_s24, %s334_s25  ;;  %p340_p7 = scmp.lt.s32.totalorder %s334_s25, %s334_s25 }
 0x210   :  { %197 = vrot.lane.b32.xlu1 %v171_v47, %s375_s21 }
 0x211   :  { %p341_p8 = por %p340_p7, %p339_p6 }
 0x213   :  { %p342_p9 = pnand %p341_p8, %p335_p5 }
 0x276   :  { %v174_v50 = vpop.permute.xlu1 %173  ;;  %v178_v51 = vpop.permute.xlu0 %177 }
 0x277   :  { %v201_v52 = vsel %vm200_vm4, %v174_v50, %v141_v49 }
 0x278   :  { %v203_v53 = vsel %vm202_vm5, %v201_v52, %v178_v51 }
 0x27a   :  { %v182_v54 = vpop.permute.xlu1 %181  ;;  %v186_v55 = vpop.permute.xlu0 %185 }
 0x27b   :  { %v205_v56 = vsel %vm204_vm6, %v203_v53, %v182_v54 }
 0x27c   :  { %v207_v57 = vsel %vm206_vm7, %v205_v56, %v186_v55 }
 0x27e   :  { %v190_v58 = vpop.permute.xlu1 %189  ;;  %v194_v60 = vpop.permute.xlu0 %193 }
 0x27f   :  { %v209_v59 = vsel %vm208_vm8, %v207_v57, %v190_v58 }
 0x280   :  { %v211_v62 = vsel %vm210_vm9, %v209_v59, %v194_v60 }
 0x282   :  { %v198_v63 = vpop.permute.xlu1 %197 }
 0x283   :  { %v213_v0 = vsel %vm212_vm10, %v211_v62, %v198_v63 }
 0x284   :  { %v221_v1 = vmul.f32 %v254_v61, %v213_v0 }
 0x286   :  { %223 = vst.msk [vmem:[#allocation2] sm:$0x3] %vm222_vm11, %v221_v1 }
 0x287   :  { %345 = shalt.err (!%p342_p9)
}
 0x288   :  { %233 = dma.vmem_to_hbm [thread:$0]  %s231_s24, 32, %s452_s4, [#allocation3]  }
 0x289   :  { %354 = dma.done.wait [#allocation3], 32  }
 0x28a   :  { %355 = vsyncadd [#allocation3], 4294967264 }
 0x28b   :  { %356 = dma.done.wait [#allocation5], 32  }
 0x28c   :  { %357 = vsyncadd [#allocation5], 4294967264 }
 0x28d   :  { %250 = vsyncpa [#allocation3], 1 }
 0x28e   :  { %251 = vsyncpa [#allocation5], 1 }

</bundles_post_ra>
